<compile_context>
chip_gen: v5e
topology: v5e:2x2
jax: 0.10.0
libtpu: 0.0.40
codegen_flags: <defaults>
</compile_context>

<pallas_src>
import functools

import jax
import jax.numpy as jnp
from jax.experimental import pallas as pl
from jax.experimental.pallas import tpu as pltpu


# ------------------------------ Pallas kernel ------------------------------ #

def _gcn_stack_kernel(a_ref, x_ref, w_ref, b_ref, o_ref,
                      acc_ref, xw_ref, h_ref, *, tm, tk):
    l = pl.program_id(0)           # layer (sequential)
    i = pl.program_id(1)           # output row tile
    k = pl.program_id(2)           # reduction tile over Â columns (last axis)
    n_layers = pl.num_programs(0)
    n_k = pl.num_programs(2)

    # --- per-layer prologue: hoisted feature transform XW_l = H_{l-1} @ W_l ---
    # Computed ONCE per layer, stored as bf16 for the aggregation matmuls.
    @pl.when(jnp.logical_and(i == 0, k == 0))
    def _():
        @pl.when(l == 0)
        def _():
            xw_ref[...] = jnp.dot(
                x_ref[...], w_ref[...],
                preferred_element_type=jnp.float32).astype(xw_ref.dtype)

        @pl.when(l > 0)
        def _():
            xw_ref[...] = jnp.dot(
                h_ref[...], w_ref[...],
                preferred_element_type=jnp.float32).astype(xw_ref.dtype)

    # --- accumulator init at the start of each (layer, row-tile) reduction ---
    @pl.when(k == 0)
    def _():
        acc_ref[...] = jnp.zeros_like(acc_ref)

    # --- pure MXU accumulate: acc += Â_l[i-tile, k-tile] @ XW_l[k-tile, :] ---
    kk = pl.multiple_of(k * tk, tk)
    acc_ref[...] += jnp.dot(
        a_ref[...], xw_ref[pl.ds(kk, tk), :],
        preferred_element_type=jnp.float32)

    # --- epilogue: bias (+ ReLU except last layer), persist activation, emit ---
    @pl.when(k == n_k - 1)
    def _():
        h = acc_ref[...] + b_ref[...]                   # (tm,F) + (1,F)
        h = jnp.where(l == n_layers - 1, h, jnp.maximum(h, 0.0))
        ii = pl.multiple_of(i * tm, tm)
        h_ref[pl.ds(ii, tm), :] = h                     # next layer's input
        o_ref[...] = h.astype(o_ref.dtype)              # last layer's survives


# -------------------------------- Wrapper ---------------------------------- #

def _round_up(x, m):
    return ((x + m - 1) // m) * m


def gcn_stack_forward(graphs, x, params, *, tm=128, tk=128):
    """Fused GCN stack: relu(Â_i @ X @ W_i + b_i) for i < L-1, linear last."""
    n = x.shape[0]
    n_layers = len(params)
    assert len(graphs) == n_layers

    f_dims = [x.shape[1]] + [w.shape[1] for w, _ in params]
    f_pad = _round_up(max(f_dims), 128)          # lane-dense feature width
    n_pad = _round_up(n, max(tm, tk))

    # Pad + stack so block shapes are uniform across layers (zero padding is
    # exact: padded W cols/rows and Â rows/cols contribute nothing to real rows).
    a_stack = jnp.zeros((n_layers, n_pad, n_pad), jnp.float32)
    w_stack = jnp.zeros((n_layers, f_pad, f_pad), jnp.float32)
    b_stack = jnp.zeros((n_layers, 1, f_pad), jnp.float32)
    for li, (a, (w, b)) in enumerate(zip(graphs, params)):
        a_stack = a_stack.at[li, :n, :n].set(a.astype(jnp.float32))
        w_stack = w_stack.at[li, :w.shape[0], :w.shape[1]].set(w)
        b_stack = b_stack.at[li, 0, :b.shape[0]].set(b)
    a_stack = a_stack.astype(jnp.bfloat16)       # halve the dominant HBM stream
    x_pad = jnp.zeros((n_pad, f_pad), jnp.float32).at[:n, :x.shape[1]].set(x)

    grid = (n_layers, n_pad // tm, n_pad // tk)

    # Rough VMEM budget: double-buffered Â/W/b/out blocks + resident X +
    # persistent acc / XW / H scratch, with slack.
    vmem_bytes = (2 * tm * tk * 2                 # Â blocks (bf16, 2 bufs)
                  + n_pad * f_pad * 4             # X resident
                  + 2 * f_pad * f_pad * 4         # W blocks
                  + 2 * f_pad * 4                 # b blocks
                  + 2 * tm * f_pad * 4            # out blocks
                  + tm * f_pad * 4                # accumulator
                  + n_pad * f_pad * 2             # XW scratch (bf16)
                  + n_pad * f_pad * 4)            # H scratch (f32)
    vmem_limit = int(min(max(2 * vmem_bytes, 8 << 20), 100 << 20))

    kernel = functools.partial(_gcn_stack_kernel, tm=tm, tk=tk)
    out = pl.pallas_call(
        kernel,
        out_shape=jax.ShapeDtypeStruct((n_pad, f_pad), jnp.float32),
        grid=grid,
        in_specs=[
            pl.BlockSpec((None, tm, tk), lambda l, i, k: (l, i, k)),        # Â
            pl.BlockSpec((n_pad, f_pad), lambda l, i, k: (0, 0)),           # X
            pl.BlockSpec((None, f_pad, f_pad), lambda l, i, k: (l, 0, 0)),  # W
            pl.BlockSpec((None, 1, f_pad), lambda l, i, k: (l, 0, 0)),      # b
        ],
        out_specs=pl.BlockSpec((tm, f_pad), lambda l, i, k: (i, 0)),
        scratch_shapes=[
            pltpu.VMEM((tm, f_pad), jnp.float32),       # accumulator
            pltpu.VMEM((n_pad, f_pad), jnp.bfloat16),   # XW (per-layer)
            pltpu.VMEM((n_pad, f_pad), jnp.float32),    # activation H
        ],
        compiler_params=pltpu.CompilerParams(
            dimension_semantics=("arbitrary", "arbitrary", "arbitrary"),
            vmem_limit_bytes=vmem_limit),
    )(a_stack, x_pad, w_stack, b_stack)

    out_dim = params[-1][0].shape[1]
    return out[:n, :out_dim]


class GCNminiPallas:
    """JAX/Pallas port of GCNmini (use_ln=False path)."""

    def __init__(self, in_dim, hid_dim, out_dim, n_layers, key):
        self.n_layers = n_layers
        if n_layers > 1:
            dims = [in_dim] + [hid_dim] * (n_layers - 1) + [out_dim]
        else:
            dims = [in_dim, hid_dim]          # mirrors the PyTorch __init__
        self.params = []
        for li in range(len(dims) - 1):
            fin, fout = dims[li], dims[li + 1]
            key, sub = jax.random.split(key)
            limit = jnp.sqrt(6.0 / (fin + fout))   # Xavier-uniform (DGL default)
            w = jax.random.uniform(sub, (fin, fout), jnp.float32, -limit, limit)
            b = jnp.zeros((fout,), jnp.float32)
            self.params.append((w, b))
        # TODO(synk): use_ln=True (BatchNorm1d between conv and ReLU) is not
        # implemented; the default use_ln=False path is reproduced exactly.

    def __call__(self, graphs, x):
        return gcn_stack_forward(graphs, x, self.params)


# -------------------------------- Utilities -------------------------------- #

def normalized_adjacency(adj):
    """Â = D^{-1/2} A D^{-1/2} (GraphConv norm='both')."""
    deg = jnp.sum(adj, axis=1)
    d_inv_sqrt = jnp.where(deg > 0, 1.0 / jnp.sqrt(deg), 0.0)
    return adj * d_inv_sqrt[:, None] * d_inv_sqrt[None, :]


def reference_forward_f32(graphs, x, params):
    h = x
    for i, (w, b) in enumerate(params):
        h = graphs[i] @ (h @ w) + b[None, :]
        if i < len(params) - 1:
            h = jnp.maximum(h, 0.0)
    return h


# ---------------------------------- Main ------------------------------------ #

if __name__ == "__main__":
    key = jax.random.PRNGKey(0)

    N, IN_DIM, HID_DIM, OUT_DIM, N_LAYERS = 32, 16, 32, 8, 3

    # Deterministic random undirected graphs with self-loops (one per layer).
    graphs = []
    for _ in range(N_LAYERS):
        key, sub = jax.random.split(key)
        a = (jax.random.uniform(sub, (N, N)) < 0.15).astype(jnp.float32)
        a = jnp.maximum(a, a.T)                             # symmetric
        a = jnp.maximum(a, jnp.eye(N, dtype=jnp.float32))   # self-loops
        graphs.append(normalized_adjacency(a))

    key, sub = jax.random.split(key)
    x = jax.random.normal(sub, (N, IN_DIM), jnp.float32)

    key, sub = jax.random.split(key)
    model = GCNminiPallas(IN_DIM, HID_DIM, OUT_DIM, N_LAYERS, sub)

    out = jax.block_until_ready(model(graphs, x))
    assert out.shape == (N, OUT_DIM)

    # bf16 Â / bf16 XW with f32 accumulation vs. pure-f32 reference.
    ref = reference_forward_f32(graphs, x, model.params)
    assert jnp.allclose(out, ref, atol=5e-2, rtol=5e-2), \
        float(jnp.max(jnp.abs(out - ref)))

    print("KERNEL_OK")
</pallas_src>

<mosaic_0001>
module attributes {stable_mosaic.version = 11 : i64} {
  func.func @_gcn_stack_kernel(%arg0: i32, %arg1: i32, %arg2: i32, %arg3: memref<1x128x128xbf16, #tpu.memory_space<vmem>>, %arg4: memref<128x128xf32, #tpu.memory_space<vmem>>, %arg5: memref<1x128x128xf32, #tpu.memory_space<vmem>>, %arg6: memref<1x1x128xf32, #tpu.memory_space<vmem>>, %arg7: memref<128x128xf32, #tpu.memory_space<vmem>>, %arg8: memref<128x128xf32, #tpu.memory_space<vmem>>, %arg9: memref<128x128xbf16, #tpu.memory_space<vmem>>, %arg10: memref<128x128xf32, #tpu.memory_space<vmem>>) attributes {dimension_semantics = [#tpu.dimension_semantics<arbitrary>, #tpu.dimension_semantics<arbitrary>, #tpu.dimension_semantics<arbitrary>], iteration_bounds = array<i64: 3, 1, 1>, scalar_prefetch = 0 : i64, scratch_operands = 3 : i64, tpu.core_type = #tpu.core_type<tc>, window_params = [{transform_indices = @transform_0, window_bounds = array<i64: 1, 128, 128>}, {pipeline_mode = #tpu.pipeline_mode<synchronous>, transform_indices = @transform_1, window_bounds = array<i64: 128, 128>}, {transform_indices = @transform_2, window_bounds = array<i64: 1, 128, 128>}, {transform_indices = @transform_3, window_bounds = array<i64: 1, 1, 128>}, {transform_indices = @transform_4, window_bounds = array<i64: 128, 128>}]} {
    %c0_i32 = arith.constant 0 : i32
    %0 = arith.cmpi eq, %arg1, %c0_i32 : i32
    %c0_i32_0 = arith.constant 0 : i32
    %1 = arith.cmpi eq, %arg2, %c0_i32_0 : i32
    %2 = arith.andi %0, %1 : i1
    %3 = arith.extui %2 : i1 to i32
    %c0_i32_1 = arith.constant 0 : i32
    %4 = arith.cmpi ne, %3, %c0_i32_1 : i32
    scf.if %4 {
      %c0_i32_13 = arith.constant 0 : i32
      %21 = arith.cmpi eq, %arg0, %c0_i32_13 : i32
      %22 = arith.extui %21 : i1 to i32
      %c0_i32_14 = arith.constant 0 : i32
      %23 = arith.cmpi ne, %22, %c0_i32_14 : i32
      scf.if %23 {
        %c0_17 = arith.constant 0 : index
        %c0_18 = arith.constant 0 : index
        %27 = vector.load %arg4[%c0_17, %c0_18] : memref<128x128xf32, #tpu.memory_space<vmem>>, vector<128x128xf32>
        %c0_19 = arith.constant 0 : index
        %c0_20 = arith.constant 0 : index
        %c0_21 = arith.constant 0 : index
        %28 = vector.load %arg5[%c0_19, %c0_20, %c0_21] : memref<1x128x128xf32, #tpu.memory_space<vmem>>, vector<1x128x128xf32>
        %29 = vector.shape_cast %28 : vector<1x128x128xf32> to vector<128x128xf32>
        %cst_22 = arith.constant dense<0.000000e+00> : vector<128x128xf32>
        %30 = tpu.matmul %27, %29, %cst_22 {dimension_numbers = #tpu.dot_dimension_numbers<[1], [0], [0], [1], [0, 0, 1, 1], [], []>} : vector<128x128xf32>, vector<128x128xf32>, vector<128x128xf32> -> vector<128x128xf32>
        %31 = arith.truncf %30 : vector<128x128xf32> to vector<128x128xbf16>
        %c0_23 = arith.constant 0 : index
        %c0_24 = arith.constant 0 : index
        %32 = vector.load %arg9[%c0_23, %c0_24] : memref<128x128xbf16, #tpu.memory_space<vmem>>, vector<128x128xbf16>
        tpu.vector_store %arg9[%c0_23, %c0_24], %31 {strides = array<i32>} : memref<128x128xbf16, #tpu.memory_space<vmem>>, vector<128x128xbf16>,
      } else {
      }
      %c0_i32_15 = arith.constant 0 : i32
      %24 = arith.cmpi sgt, %arg0, %c0_i32_15 : i32
      %25 = arith.extui %24 : i1 to i32
      %c0_i32_16 = arith.constant 0 : i32
      %26 = arith.cmpi ne, %25, %c0_i32_16 : i32
      scf.if %26 {
        %c0_17 = arith.constant 0 : index
        %c0_18 = arith.constant 0 : index
        %27 = vector.load %arg10[%c0_17, %c0_18] : memref<128x128xf32, #tpu.memory_space<vmem>>, vector<128x128xf32>
        %c0_19 = arith.constant 0 : index
        %c0_20 = arith.constant 0 : index
        %c0_21 = arith.constant 0 : index
        %28 = vector.load %arg5[%c0_19, %c0_20, %c0_21] : memref<1x128x128xf32, #tpu.memory_space<vmem>>, vector<1x128x128xf32>
        %29 = vector.shape_cast %28 : vector<1x128x128xf32> to vector<128x128xf32>
        %cst_22 = arith.constant dense<0.000000e+00> : vector<128x128xf32>
        %30 = tpu.matmul %27, %29, %cst_22 {dimension_numbers = #tpu.dot_dimension_numbers<[1], [0], [0], [1], [0, 0, 1, 1], [], []>} : vector<128x128xf32>, vector<128x128xf32>, vector<128x128xf32> -> vector<128x128xf32>
        %31 = arith.truncf %30 : vector<128x128xf32> to vector<128x128xbf16>
        %c0_23 = arith.constant 0 : index
        %c0_24 = arith.constant 0 : index
        %32 = vector.load %arg9[%c0_23, %c0_24] : memref<128x128xbf16, #tpu.memory_space<vmem>>, vector<128x128xbf16>
        tpu.vector_store %arg9[%c0_23, %c0_24], %31 {strides = array<i32>} : memref<128x128xbf16, #tpu.memory_space<vmem>>, vector<128x128xbf16>,
      } else {
      }
    } else {
    }
    %c0_i32_2 = arith.constant 0 : i32
    %5 = arith.cmpi eq, %arg2, %c0_i32_2 : i32
    %6 = arith.extui %5 : i1 to i32
    %c0_i32_3 = arith.constant 0 : i32
    %7 = arith.cmpi ne, %6, %c0_i32_3 : i32
    scf.if %7 {
      %cst_13 = arith.constant 0.000000e+00 : f32
      %21 = vector.broadcast %cst_13 : f32 to vector<128x128xf32>
      %c0_14 = arith.constant 0 : index
      %c0_15 = arith.constant 0 : index
      %22 = vector.load %arg8[%c0_14, %c0_15] : memref<128x128xf32, #tpu.memory_space<vmem>>, vector<128x128xf32>
      tpu.vector_store %arg8[%c0_14, %c0_15], %21 {strides = array<i32>} : memref<128x128xf32, #tpu.memory_space<vmem>>, vector<128x128xf32>,
    } else {
    }
    %c128_i32 = arith.constant 128 : i32
    %8 = arith.muli %arg2, %c128_i32 : i32
    %9 = tpu.assume_multiple %8, 128 : i32
    %c0 = arith.constant 0 : index
    %c0_4 = arith.constant 0 : index
    %10 = vector.load %arg8[%c0, %c0_4] : memref<128x128xf32, #tpu.memory_space<vmem>>, vector<128x128xf32>
    %c0_5 = arith.constant 0 : index
    %c0_6 = arith.constant 0 : index
    %c0_7 = arith.constant 0 : index
    %11 = vector.load %arg3[%c0_5, %c0_6, %c0_7] : memref<1x128x128xbf16, #tpu.memory_space<vmem>>, vector<1x128x128xbf16>
    %12 = vector.shape_cast %11 : vector<1x128x128xbf16> to vector<128x128xbf16>
    %13 = arith.index_cast %9 : i32 to index
    %c0_8 = arith.constant 0 : index
    %14 = vector.load %arg9[%13, %c0_8] : memref<128x128xbf16, #tpu.memory_space<vmem>>, vector<128x128xbf16>
    %cst = arith.constant dense<0.000000e+00> : vector<128x128xf32>
    %15 = tpu.matmul %12, %14, %cst {dimension_numbers = #tpu.dot_dimension_numbers<[1], [0], [0], [1], [0, 0, 1, 1], [], []>} : vector<128x128xbf16>, vector<128x128xbf16>, vector<128x128xf32> -> vector<128x128xf32>
    %16 = arith.addf %10, %15 : vector<128x128xf32>
    %c0_9 = arith.constant 0 : index
    %c0_10 = arith.constant 0 : index
    %17 = vector.load %arg8[%c0_9, %c0_10] : memref<128x128xf32, #tpu.memory_space<vmem>>, vector<128x128xf32>
    tpu.vector_store %arg8[%c0_9, %c0_10], %16 {strides = array<i32>} : memref<128x128xf32, #tpu.memory_space<vmem>>, vector<128x128xf32>,
    %c0_i32_11 = arith.constant 0 : i32
    %18 = arith.cmpi eq, %arg2, %c0_i32_11 : i32
    %19 = arith.extui %18 : i1 to i32
    %c0_i32_12 = arith.constant 0 : i32
    %20 = arith.cmpi ne, %19, %c0_i32_12 : i32
    scf.if %20 {
      %c0_13 = arith.constant 0 : index
      %c0_14 = arith.constant 0 : index
      %21 = vector.load %arg8[%c0_13, %c0_14] : memref<128x128xf32, #tpu.memory_space<vmem>>, vector<128x128xf32>
      %c0_15 = arith.constant 0 : index
      %c0_16 = arith.constant 0 : index
      %c0_17 = arith.constant 0 : index
      %22 = vector.load %arg6[%c0_15, %c0_16, %c0_17] : memref<1x1x128xf32, #tpu.memory_space<vmem>>, vector<1x1x128xf32>
      %23 = vector.shape_cast %22 : vector<1x1x128xf32> to vector<1x128xf32>
      %24 = vector.broadcast %23 : vector<1x128xf32> to vector<128x128xf32>
      %25 = arith.addf %21, %24 : vector<128x128xf32>
      %c2_i32 = arith.constant 2 : i32
      %26 = arith.cmpi eq, %arg0, %c2_i32 : i32
      %cst_18 = arith.constant 0.000000e+00 : f32
      %27 = vector.broadcast %cst_18 : f32 to vector<128x128xf32>
      %28 = arith.maximumf %25, %27 : vector<128x128xf32>
      %29 = arith.select %26, %25, %28 : vector<128x128xf32>
      %c128_i32_19 = arith.constant 128 : i32
      %30 = arith.muli %arg1, %c128_i32_19 : i32
      %31 = tpu.assume_multiple %30, 128 : i32
      %32 = arith.index_cast %31 : i32 to index
      %c0_20 = arith.constant 0 : index
      %33 = vector.load %arg10[%32, %c0_20] : memref<128x128xf32, #tpu.memory_space<vmem>>, vector<128x128xf32>
      tpu.vector_store %arg10[%32, %c0_20], %29 {strides = array<i32>} : memref<128x128xf32, #tpu.memory_space<vmem>>, vector<128x128xf32>,
      %c0_21 = arith.constant 0 : index
      %c0_22 = arith.constant 0 : index
      %34 = vector.load %arg7[%c0_21, %c0_22] : memref<128x128xf32, #tpu.memory_space<vmem>>, vector<128x128xf32>
      tpu.vector_store %arg7[%c0_21, %c0_22], %29 {strides = array<i32>} : memref<128x128xf32, #tpu.memory_space<vmem>>, vector<128x128xf32>,
    } else {
    }
    return
  }
  func.func @transform_0(%arg0: i32, %arg1: i32, %arg2: i32) -> (i32, i32, i32) {
    %c0_i32 = arith.constant 0 : i32
    return %arg0, %arg1, %arg2 : i32, i32, i32
  }
  func.func @transform_1(%arg0: i32, %arg1: i32, %arg2: i32) -> (i32, i32) {
    %c0_i32 = arith.constant 0 : i32
    %c0_i32_0 = arith.constant 0 : i32
    %c0_i32_1 = arith.constant 0 : i32
    return %c0_i32, %c0_i32_0 : i32, i32
  }
  func.func @transform_2(%arg0: i32, %arg1: i32, %arg2: i32) -> (i32, i32, i32) {
    %c0_i32 = arith.constant 0 : i32
    %c0_i32_0 = arith.constant 0 : i32
    %c0_i32_1 = arith.constant 0 : i32
    return %arg0, %c0_i32, %c0_i32_0 : i32, i32, i32
  }
  func.func @transform_3(%arg0: i32, %arg1: i32, %arg2: i32) -> (i32, i32, i32) {
    %c0_i32 = arith.constant 0 : i32
    %c0_i32_0 = arith.constant 0 : i32
    %c0_i32_1 = arith.constant 0 : i32
    return %arg0, %c0_i32, %c0_i32_0 : i32, i32, i32
  }
  func.func @transform_4(%arg0: i32, %arg1: i32, %arg2: i32) -> (i32, i32) {
    %c0_i32 = arith.constant 0 : i32
    %c0_i32_0 = arith.constant 0 : i32
    return %arg1, %c0_i32 : i32, i32
  }
}

</mosaic_0001>

<bundles_post_ra>
// kernel: tpu_custom_call.1
= control target key start
LH: loop header
LB: loop body
LE: loop exit
PB: predicated region body
PF: predicated region fallthrough
CT: control target
= control target key end

     0   :  { %9 = vsyncpa [#allocation6], 0  ;;  %s1996_s0 = inlined_call_operand.hbm [shape: bf16[3,128,128], index: 0, kind: input, shape index: {}]   ;;  %s1997_s1 = inlined_call_operand.hbm [shape: f32[128,128], index: 1, kind: input, shape index: {}]   ;;  %s1998_s2 = inlined_call_operand.hbm [shape: f32[3,128,128], index: 2, kind: input, shape index: {}]   ;;  %s1999_s3 = inlined_call_operand.hbm [shape: f32[3,1,128], index: 3, kind: input, shape index: {}]   ;;  %s2000_s4 = inlined_call_operand.hbm [shape: f32[128,128], index: 4, kind: output, shape index: {}]  }
   0x1   :  { %11 = vsyncpa [#allocation6 + $0x1], 0 }
   0x2   :  { %12 = vsyncpa [#allocation9], 0 }
   0x3   :  { %13 = vsyncpa [#allocation7], 0  ;;  %s1740_s15 = smov 0   ;;  %s1742_s16 = smov 0  }
   0x4   :  { %s1744_s17 = smov 0   ;;  %s1746_s18 = smov 0  }
   0x5   :  { %s1748_s19 = smov 0   ;;  %s1750_s20 = smov 0  }
   0x6 LB: > { %s38_s21 = sadd.s32 1, %s1701_s19  ;;  %s49_s22 = sadd.s32 1, %s1693_s17  ;;  %s1705_s20 = sphi %s1750_s20, %s19_s20   ;;  %s1701_s19 = sphi %s1748_s19, %s2011_s19   ;;  %s1697_s18 = sphi %s1746_s18, %s2010_s18   ;;  %s1693_s17 = sphi %s1744_s17, %s2009_s17   ;;  %s1689_s16 = sphi %s1742_s16, %s2008_s16   ;;  %s1685_s15 = sphi %s1740_s15, %s2007_s15  }
   0x7   : > { %p40_p0 = scmp.ge.s32.totalorder %s38_s21, 3  ;;  %p56_p1 = scmp.ne.s32.totalorder %s1693_s17, %s1689_s16 }
   0x8   : > { %p57_p2 = scmp.eq.s32.totalorder %s1705_s20, 0  ;;  %p1434_p4 = scmp.lt.s32.totalorder %s1705_s20, 3 }
   0x9   : > { %s2013_s21 = smov (%p40_p0, %s38_s21), 0  ;;  %s199_s25 = sand.u32 1, %s1705_s20  }
   0xa   : > { %p1777_p3 = por %p57_p2, %p56_p1  ;;  %s42_s24 = ssub.s32 %s1701_s19, %s2013_s21 }
   0xb   : > { %p47_p5 = scmp.eq.s32.totalorder %s42_s24, 0  ;;  %s1786_s26 = sand.u32 1, %s1693_s17  }
   0xc   : > { %s1173_s27 = sshll.u32 %s1701_s19, 6  ;;  %s1093_s29 = sshll.u32 %s1786_s26, 6 }
   0xd   : > { %s1790_s28 = scalar_select %p47_p5, %s1693_s17, %s49_s22  }
   0xe   : > { %s211_s6 = scalar_lea.hbm %s1996_s0, %s1173_s27  ;;  %s203_s8 = scalar_lea.vmem [#allocation5], %s1093_s29 }
   0xf   : > { %s212_s7 = sshll.u32 %s211_s6, 4  ;;  %s214_s9 = sshll.u32 %s203_s8, 4  ;;  %s213_s7 = int_to_ptr.hbm [resolvable:$true] %s212_s7  ;;  %s215_s9 = int_to_ptr.vmem [resolvable:$true] %s214_s9 }
  0x10   : > { %p1800_p6 = pnand %p1434_p4, %p1777_p3  ;;  %s1804_s11 = scalar_lea.sflag [#allocation6], %s199_s25 }
  0x11   : > { %s1707_s12 = smov 64   ;;  %s1708_s13 = smov 4  }
  0x12   : > { %1426 = dma.hbm_to_vmem [thread:$0]  (!%p1800_p6), %s213_s7, 1024, %s215_s9, %s1804_s11, %s1707_s12, %s1707_s12, %s1708_s13  }
  0x13   : > { %s1096_s14 = sshll.u32 %s1786_s26, 7  ;;  %s1174_s22 = sshll.u32 %s1701_s19, 7 }
  0x14   : > { %s233_s27 = scalar_lea.hbm %s1998_s2, %s1174_s22  ;;  %s228_s29 = scalar_lea.vmem [#allocation10], %s1096_s14 }
  0x15   : > { %s236_s30 = sshll.u32 %s228_s29, 4  ;;  %s234_s25 = sshll.u32 %s233_s27, 4  ;;  %s237_s30 = int_to_ptr.vmem [resolvable:$true] %s236_s30  ;;  %s235_s25 = int_to_ptr.hbm [resolvable:$true] %s234_s25 }
  0x16   : > { %s1709_s5 = smov 128   ;;  %s1710_s6 = smov 8  }
  0x17   : > { %1429 = dma.hbm_to_vmem [thread:$0]  (!%p1800_p6), %s235_s25, 2048, %s237_s30, %s1804_s11, %s1709_s5, %s1709_s5, %s1710_s6  }
  0x18   : > { %s1818_s8 = sadd.s32 4294967295, %s1705_s20   ;;  %p62_p7 = scmp.ne.s32.totalorder %s1689_s16, %s1685_s15 }
  0x19   : > { %p63_p8 = scmp.eq.s32.totalorder %s1818_s8, 0  ;;  %p1090_p9 = scmp.ge.s32.totalorder %s1705_s20, 1 }
  0x1a   : > { %p172_p10 = scmp.lt.s32.totalorder %s1705_s20, 4  ;;  %s183_s14 = sshll.u32 %s1997_s1, 4  ;;  %s184_s14 = int_to_ptr.hbm [resolvable:$true] %s183_s14 }
  0x1b   : > { %p1827_p11 = por %p63_p8, %p62_p7  ;;  %s1711_s15 = smov [#allocation8]  }
  0x1c   : > { %p1831_p12 = pnand %p1090_p9, %p172_p10  ;;  %s185_s22 = sshll.u32 %s1711_s15, 4  ;;  %s186_s22 = int_to_ptr.vmem [resolvable:$true] %s185_s22 }
  0x1d   : > { %s252_s27 = scalar_lea.hbm %s1999_s3, %s1701_s19  ;;  %s249_s30 = scalar_lea.vmem [#allocation11], %s1786_s26 }
  0x1e   : > { %p1419_p13 = pneg %p1831_p12  ;;  %s254_s29 = sshll.u32 %s252_s27, 4  ;;  %s255_s29 = int_to_ptr.hbm [resolvable:$true] %s254_s29 }
  0x1f   : > { %s256_s25 = sshll.u32 %s249_s30, 4  ;;  %265 = sbr.rel (%p1831_p12) target bundleno = 653 (0x28d), region = 36  ;;  %s257_s25 = int_to_ptr.vmem [resolvable:$true] %s256_s25 }
  0x20   : > { %p1420_p0 = pnand %p1419_p13, %p63_p8  ;;  %s267_s12 = sand.u32 (!%p1831_p12), 1, %s1818_s8  }
  0x21   : > { %1432 = dma.hbm_to_vmem [thread:$0]  (!%p1800_p6), %s255_s29, 16, %s257_s25, %s1804_s11  }
  0x22   : > { %1422 = dma.hbm_to_vmem [thread:$0]  (!%p1420_p0), %s184_s14, 2048, %s186_s22, [#allocation9], %s1709_s5, %s1709_s5, %s1710_s6  }
  0x23   : > { %s1854_s13 = sand.u32 (!%p1831_p12), 1, %s1689_s16   ;;  %s268_s23 = scalar_lea.sflag (!%p1831_p12), [#allocation6], %s267_s12 }
  0x24   : > { %s1100_s15 = sshll.u32 %s1854_s13, 6 }
  0x25   : > { %s1857_s24 = scalar_lea.vmem [#allocation5], %s1100_s15 }
  0x26   : > { %1668 = dma.done.wait (%p1827_p11), %s268_s23, 1024  }
  0x27   : > { %1670 = vsyncadd (%p1827_p11), %s268_s23, 4294966272 }
  0x28   : > { %1672 = dma.done.wait (%p63_p8), [#allocation9], 2048  }
  0x29   : > { %1674 = vsyncadd (%p63_p8), [#allocation9], 4294965248  ;;  %s1102_s26 = sshll.u32 %s1854_s13, 7 }
  0x2a   : > { %s1868_s10 = scalar_lea.vmem [#allocation10], %s1102_s26 }
  0x2b   : > { %1676 = dma.done.wait (%p1827_p11), %s268_s23, 2064  }
  0x2c   : > { %1678 = vsyncadd (%p1827_p11), %s268_s23, 4294965232  ;;  %s295_s11 = scalar_lea.vmem [#allocation11], %s1854_s13  ;;  %p1103_p1 = scmp.ne.s32.totalorder %s1697_s18, 0 }
  0x2e   : > { %336 = sbr.rel (%p1103_p1) target bundleno = 245 (0xf5), region = 60 }
  0x33   : > { %v368_v0 = vld [vmem:[%s1868_s10 + $0x78] sm:$0xff]  ;;  %v367_v1 = vld [vmem:[%s1868_s10 + $0x70] sm:$0xff]  ;;  %v366_v2 = vld [vmem:[%s1868_s10 + $0x68] sm:$0xff] }
  0x34   : > { %369 = vmatpush.msra.mxu0 %v368_v0  ;;  %1285 = vmatpush.msra.mxu1 %v368_v0  ;;  %v365_v3 = vld [vmem:[%s1868_s10 + $0x60] sm:$0xff]  ;;  %v364_v4 = vld [vmem:[%s1868_s10 + $0x58] sm:$0xff]  ;;  %v363_v5 = vld [vmem:[%s1868_s10 + $0x50] sm:$0xff] }
  0x35   : > { %1286 = vmatpush.msra.mxu2 %v368_v0  ;;  %1287 = vmatpush.msra.mxu3 %v368_v0  ;;  %v362_v6 = vld [vmem:[%s1868_s10 + $0x48] sm:$0xff]  ;;  %v361_v7 = vld [vmem:[%s1868_s10 + $0x40] sm:$0xff]  ;;  %v360_v8 = vld [vmem:[%s1868_s10 + $0x38] sm:$0xff] }
  0x36   : > { %370 = vmatpush.msra.mxu0 %v367_v1  ;;  %1288 = vmatpush.msra.mxu1 %v367_v1  ;;  %v359_v9 = vld [vmem:[%s1868_s10 + $0x30] sm:$0xff]  ;;  %v358_v10 = vld [vmem:[%s1868_s10 + $0x28] sm:$0xff]  ;;  %v357_v11 = vld [vmem:[%s1868_s10 + $0x20] sm:$0xff] }
  0x37   : > { %1289 = vmatpush.msra.mxu2 %v367_v1  ;;  %1290 = vmatpush.msra.mxu3 %v367_v1  ;;  %v356_v12 = vld [vmem:[%s1868_s10 + $0x18] sm:$0xff]  ;;  %v355_v13 = vld [vmem:[%s1868_s10 + $0x10] sm:$0xff]  ;;  %v354_v14 = vld [vmem:[%s1868_s10 + $0x8] sm:$0xff] }
  0x38   : > { %371 = vmatpush.msra.mxu0 %v366_v2  ;;  %1291 = vmatpush.msra.mxu1 %v366_v2  ;;  %v353_v15 = vld [vmem:[%s1868_s10] sm:$0xff]  ;;  %v338_v20 = vld [vmem:[#allocation8 + $0x8] sm:$0xff]  ;;  %v339_v24 = vld [vmem:[#allocation8 + $0x10] sm:$0xff] }
  0x39   : > { %1292 = vmatpush.msra.mxu2 %v366_v2  ;;  %1293 = vmatpush.msra.mxu3 %v366_v2  ;;  %v337_v16 = vld [vmem:[#allocation8] sm:$0xff]  ;;  %v342_v21 = vld [vmem:[#allocation8 + $0x28] sm:$0xff]  ;;  %v343_v25 = vld [vmem:[#allocation8 + $0x30] sm:$0xff] }
  0x3a   : > { %372 = vmatpush.msra.mxu0 %v365_v3  ;;  %1294 = vmatpush.msra.mxu1 %v365_v3  ;;  %v341_v17 = vld [vmem:[#allocation8 + $0x20] sm:$0xff]  ;;  %v346_v22 = vld [vmem:[#allocation8 + $0x48] sm:$0xff]  ;;  %v347_v26 = vld [vmem:[#allocation8 + $0x50] sm:$0xff] }
  0x3b   : > { %1295 = vmatpush.msra.mxu2 %v365_v3  ;;  %1296 = vmatpush.msra.mxu3 %v365_v3  ;;  %v345_v18 = vld [vmem:[#allocation8 + $0x40] sm:$0xff]  ;;  %v350_v23 = vld [vmem:[#allocation8 + $0x68] sm:$0xff]  ;;  %v351_v27 = vld [vmem:[#allocation8 + $0x70] sm:$0xff] }
  0x3c   : > { %373 = vmatpush.msra.mxu0 %v364_v4  ;;  %1297 = vmatpush.msra.mxu1 %v364_v4  ;;  %v349_v19 = vld [vmem:[#allocation8 + $0x60] sm:$0xff]  ;;  %v340_v28 = vld [vmem:[#allocation8 + $0x18] sm:$0xff] }
  0x3d   : > { %1298 = vmatpush.msra.mxu2 %v364_v4  ;;  %1299 = vmatpush.msra.mxu3 %v364_v4  ;;  %v344_v29 = vld [vmem:[#allocation8 + $0x38] sm:$0xff] }
  0x3e   : > { %374 = vmatpush.msra.mxu0 %v363_v5  ;;  %1300 = vmatpush.msra.mxu1 %v363_v5  ;;  %v348_v30 = vld [vmem:[#allocation8 + $0x58] sm:$0xff] }
  0x3f   : > { %1301 = vmatpush.msra.mxu2 %v363_v5  ;;  %1302 = vmatpush.msra.mxu3 %v363_v5  ;;  %v352_v31 = vld [vmem:[#allocation8 + $0x78] sm:$0xff] }
  0x40   : > { %375 = vmatpush.msra.mxu0 %v362_v6  ;;  %1303 = vmatpush.msra.mxu1 %v362_v6 }
  0x41   : > { %1304 = vmatpush.msra.mxu2 %v362_v6  ;;  %1305 = vmatpush.msra.mxu3 %v362_v6 }
  0x42   : > { %376 = vmatpush.msra.mxu0 %v361_v7  ;;  %1306 = vmatpush.msra.mxu1 %v361_v7 }
  0x43   : > { %1307 = vmatpush.msra.mxu2 %v361_v7  ;;  %1308 = vmatpush.msra.mxu3 %v361_v7 }
  0x44   : > { %377 = vmatpush.msra.mxu0 %v360_v8  ;;  %1309 = vmatpush.msra.mxu1 %v360_v8 }
  0x45   : > { %1310 = vmatpush.msra.mxu2 %v360_v8  ;;  %1311 = vmatpush.msra.mxu3 %v360_v8 }
  0x46   : > { %378 = vmatpush.msra.mxu0 %v359_v9  ;;  %1312 = vmatpush.msra.mxu1 %v359_v9 }
  0x47   : > { %1313 = vmatpush.msra.mxu2 %v359_v9  ;;  %1314 = vmatpush.msra.mxu3 %v359_v9 }
  0x48   : > { %379 = vmatpush.msra.mxu0 %v358_v10  ;;  %1315 = vmatpush.msra.mxu1 %v358_v10 }
  0x49   : > { %1316 = vmatpush.msra.mxu2 %v358_v10  ;;  %1317 = vmatpush.msra.mxu3 %v358_v10 }
  0x4a   : > { %380 = vmatpush.msra.mxu0 %v357_v11  ;;  %1318 = vmatpush.msra.mxu1 %v357_v11 }
  0x4b   : > { %1319 = vmatpush.msra.mxu2 %v357_v11  ;;  %1320 = vmatpush.msra.mxu3 %v357_v11 }
  0x4c   : > { %381 = vmatpush.msra.mxu0 %v356_v12  ;;  %1321 = vmatpush.msra.mxu1 %v356_v12 }
  0x4d   : > { %1322 = vmatpush.msra.mxu2 %v356_v12  ;;  %1323 = vmatpush.msra.mxu3 %v356_v12 }
  0x4e   : > { %382 = vmatpush.msra.mxu0 %v355_v13  ;;  %1324 = vmatpush.msra.mxu1 %v355_v13 }
  0x4f   : > { %1325 = vmatpush.msra.mxu2 %v355_v13  ;;  %1326 = vmatpush.msra.mxu3 %v355_v13 }
  0x50   : > { %383 = vmatpush.msra.mxu0 %v354_v14  ;;  %1327 = vmatpush.msra.mxu1 %v354_v14 }
  0x51   : > { %1328 = vmatpush.msra.mxu2 %v354_v14  ;;  %1329 = vmatpush.msra.mxu3 %v354_v14 }
  0x52   : > { %384 = vmatpush.msra.mxu0 %v353_v15  ;;  %1330 = vmatpush.msra.mxu1 %v353_v15 }
  0x53   : > { %1331 = vmatpush.msra.mxu2 %v353_v15  ;;  %1332 = vmatpush.msra.mxu3 %v353_v15 }
  0x54   : > { %385 = vmatmul.f32.vlgmr.msra.gmra.mxu0 %v337_v16  ;;  %397 = vmatmul.f32.vlgmr.msra.gmra.mxu1 %v341_v17 }
  0x55   : > { %409 = vmatmul.f32.vlgmr.msra.gmra.mxu2 %v345_v18  ;;  %421 = vmatmul.f32.vlgmr.msra.gmra.mxu3 %v349_v19 }
  0x5c   : > { %388 = vmatmul.f32.gmra.mxu0 %v338_v20  ;;  %400 = vmatmul.f32.gmra.mxu1 %v342_v21 }
  0x5d   : > { %412 = vmatmul.f32.gmra.mxu2 %v346_v22  ;;  %424 = vmatmul.f32.gmra.mxu3 %v350_v23 }
  0x64   : > { %391 = vmatmul.f32.gmra.mxu0 %v339_v24  ;;  %403 = vmatmul.f32.gmra.mxu1 %v343_v25 }
  0x65   : > { %415 = vmatmul.f32.gmra.mxu2 %v347_v26  ;;  %427 = vmatmul.f32.gmra.mxu3 %v351_v27 }
  0x6c   : > { %394 = vmatmul.f32.gmra.mxu0 %v340_v28  ;;  %406 = vmatmul.f32.gmra.mxu1 %v344_v29 }
  0x6d   : > { %418 = vmatmul.f32.gmra.mxu2 %v348_v30  ;;  %430 = vmatmul.f32.gmra.mxu3 %v352_v31 }
  0xd1   : > { %v386_v32 = vpop.f32.mrf.mxu0  ;;  %v398_v33 = vpop.f32.mrf.mxu1 }
  0xd8   : > { %v410_v34 = vpop.f32.mrf.mxu2  ;;  %v422_v35 = vpop.f32.mrf.mxu3 }
  0xd9   : > { %v389_v36 = vpop.f32.mrf.mxu0  ;;  %v401_v37 = vpop.f32.mrf.mxu1 }
  0xda   : > { %v1194_v38 = vpack.c.bf16 %v389_v36, %v386_v32  ;;  %v1204_v39 = vpack.c.bf16 %v401_v37, %v398_v33 }
  0xdc   : > { %1195 = vst [vmem:[#allocation3 + $0x30] sm:$0xff] %v1194_v38  }
  0xdd   : > { %1272 = vst [vmem:[#allocation3 + $0x18] sm:$0xff] %v1204_v39  }
  0xe0   : > { %v413_v40 = vpop.f32.mrf.mxu2  ;;  %v425_v41 = vpop.f32.mrf.mxu3 }
  0xe1   : > { %v1214_v42 = vpack.c.bf16 %v413_v40, %v410_v34  ;;  %v1224_v43 = vpack.c.bf16 %v425_v41, %v422_v35  ;;  %v392_v44 = vpop.f32.mrf.mxu0  ;;  %v404_v45 = vpop.f32.mrf.mxu1 }
  0xe3   : > { %1274 = vst [vmem:[#allocation3 + $0x8] sm:$0xff] %v1214_v42  }
  0xe4   : > { %1276 = vst [vmem:[#allocation3 + $0x28] sm:$0xff] %v1224_v43  }
  0xe8   : > { %v416_v46 = vpop.f32.mrf.mxu2  ;;  %v428_v47 = vpop.f32.mrf.mxu3 }
  0xe9   : > { %v395_v48 = vpop.f32.mrf.mxu0  ;;  %v407_v49 = vpop.f32.mrf.mxu1 }
  0xea   : > { %v1199_v50 = vpack.c.bf16 %v395_v48, %v392_v44  ;;  %v1209_v51 = vpack.c.bf16 %v407_v49, %v404_v45 }
  0xec   : > { %1271 = vst [vmem:[#allocation3] sm:$0xff] %v1199_v50  }
  0xed   : > { %1273 = vst [vmem:[#allocation3 + $0x10] sm:$0xff] %v1209_v51  }
  0xf0   : > { %v419_v52 = vpop.f32.mrf.mxu2  ;;  %v431_v53 = vpop.f32.mrf.mxu3 }
  0xf1   : > { %v1219_v54 = vpack.c.bf16 %v419_v52, %v416_v46  ;;  %v1229_v55 = vpack.c.bf16 %v431_v53, %v428_v47 }
  0xf3   : > { %1275 = vst [vmem:[#allocation3 + $0x20] sm:$0xff] %v1219_v54  }
  0xf4   : > { %1277 = vst [vmem:[#allocation3 + $0x38] sm:$0xff] %v1229_v55  }
  0xf5 PF: > { %p1104_p2 = scmp.le.s32.totalorder %s1697_s18, 0 }
  0xf7   : > { %469 = sbr.rel (%p1104_p2) target bundleno = 446 (0x1be), region = 64 }
  0xfc   : > { %v501_v56 = vld [vmem:[%s1868_s10 + $0x78] sm:$0xff]  ;;  %v500_v57 = vld [vmem:[%s1868_s10 + $0x70] sm:$0xff]  ;;  %v499_v58 = vld [vmem:[%s1868_s10 + $0x68] sm:$0xff] }
  0xfd   : > { %502 = vmatpush.msra.mxu0 %v501_v56  ;;  %1333 = vmatpush.msra.mxu1 %v501_v56  ;;  %v498_v59 = vld [vmem:[%s1868_s10 + $0x60] sm:$0xff]  ;;  %v497_v60 = vld [vmem:[%s1868_s10 + $0x58] sm:$0xff]  ;;  %v496_v61 = vld [vmem:[%s1868_s10 + $0x50] sm:$0xff] }
  0xfe   : > { %1334 = vmatpush.msra.mxu2 %v501_v56  ;;  %1335 = vmatpush.msra.mxu3 %v501_v56  ;;  %v495_v62 = vld [vmem:[%s1868_s10 + $0x48] sm:$0xff]  ;;  %v494_v63 = vld [vmem:[%s1868_s10 + $0x40] sm:$0xff]  ;;  %v493_v0 = vld [vmem:[%s1868_s10 + $0x38] sm:$0xff] }
  0xff   : > { %503 = vmatpush.msra.mxu0 %v500_v57  ;;  %1336 = vmatpush.msra.mxu1 %v500_v57  ;;  %v492_v1 = vld [vmem:[%s1868_s10 + $0x30] sm:$0xff]  ;;  %v491_v2 = vld [vmem:[%s1868_s10 + $0x28] sm:$0xff]  ;;  %v490_v3 = vld [vmem:[%s1868_s10 + $0x20] sm:$0xff] }
 0x100   : > { %1337 = vmatpush.msra.mxu2 %v500_v57  ;;  %1338 = vmatpush.msra.mxu3 %v500_v57  ;;  %v489_v4 = vld [vmem:[%s1868_s10 + $0x18] sm:$0xff]  ;;  %v488_v5 = vld [vmem:[%s1868_s10 + $0x10] sm:$0xff]  ;;  %v487_v6 = vld [vmem:[%s1868_s10 + $0x8] sm:$0xff] }
 0x101   : > { %504 = vmatpush.msra.mxu0 %v499_v58  ;;  %1339 = vmatpush.msra.mxu1 %v499_v58  ;;  %v486_v7 = vld [vmem:[%s1868_s10] sm:$0xff]  ;;  %v474_v9 = vld [vmem:[#allocation4 + $0x68] sm:$0xff]  ;;  %v482_v11 = vld [vmem:[#allocation4 + $0x58] sm:$0xff] }
 0x102   : > { %1340 = vmatpush.msra.mxu2 %v499_v58  ;;  %1341 = vmatpush.msra.mxu3 %v499_v58  ;;  %v470_v8 = vld [vmem:[#allocation4] sm:$0xff]  ;;  %v478_v10 = vld [vmem:[#allocation4 + $0x28] sm:$0xff]  ;;  %v471_v12 = vld [vmem:[#allocation4 + $0x18] sm:$0xff] }
 0x103   : > { %505 = vmatpush.msra.mxu0 %v498_v59  ;;  %1342 = vmatpush.msra.mxu1 %v498_v59  ;;  %v475_v13 = vld [vmem:[#allocation4 + $0x20] sm:$0xff]  ;;  %v483_v15 = vld [vmem:[#allocation4 + $0x48] sm:$0xff]  ;;  %v472_v16 = vld [vmem:[#allocation4 + $0x50] sm:$0xff] }
 0x104   : > { %1343 = vmatpush.msra.mxu2 %v498_v59  ;;  %1344 = vmatpush.msra.mxu3 %v498_v59  ;;  %v479_v14 = vld [vmem:[#allocation4 + $0x40] sm:$0xff]  ;;  %v476_v17 = vld [vmem:[#allocation4 + $0x70] sm:$0xff]  ;;  %v480_v18 = vld [vmem:[#allocation4 + $0x38] sm:$0xff] }
 0x105   : > { %506 = vmatpush.msra.mxu0 %v497_v60  ;;  %1345 = vmatpush.msra.mxu1 %v497_v60  ;;  %v484_v19 = vld [vmem:[#allocation4 + $0x78] sm:$0xff]  ;;  %v473_v20 = vld [vmem:[#allocation4 + $0x60] sm:$0xff]  ;;  %v477_v21 = vld [vmem:[#allocation4 + $0x10] sm:$0xff] }
 0x106   : > { %1346 = vmatpush.msra.mxu2 %v497_v60  ;;  %1347 = vmatpush.msra.mxu3 %v497_v60  ;;  %v481_v22 = vld [vmem:[#allocation4 + $0x8] sm:$0xff]  ;;  %v485_v23 = vld [vmem:[#allocation4 + $0x30] sm:$0xff] }
 0x107   : > { %507 = vmatpush.msra.mxu0 %v496_v61  ;;  %1348 = vmatpush.msra.mxu1 %v496_v61 }
 0x108   : > { %1349 = vmatpush.msra.mxu2 %v496_v61  ;;  %1350 = vmatpush.msra.mxu3 %v496_v61 }
 0x109   : > { %508 = vmatpush.msra.mxu0 %v495_v62  ;;  %1351 = vmatpush.msra.mxu1 %v495_v62 }
 0x10a   : > { %1352 = vmatpush.msra.mxu2 %v495_v62  ;;  %1353 = vmatpush.msra.mxu3 %v495_v62 }
 0x10b   : > { %509 = vmatpush.msra.mxu0 %v494_v63  ;;  %1354 = vmatpush.msra.mxu1 %v494_v63 }
 0x10c   : > { %1355 = vmatpush.msra.mxu2 %v494_v63  ;;  %1356 = vmatpush.msra.mxu3 %v494_v63 }
 0x10d   : > { %510 = vmatpush.msra.mxu0 %v493_v0  ;;  %1357 = vmatpush.msra.mxu1 %v493_v0 }
 0x10e   : > { %1358 = vmatpush.msra.mxu2 %v493_v0  ;;  %1359 = vmatpush.msra.mxu3 %v493_v0 }
 0x10f   : > { %511 = vmatpush.msra.mxu0 %v492_v1  ;;  %1360 = vmatpush.msra.mxu1 %v492_v1 }
 0x110   : > { %1361 = vmatpush.msra.mxu2 %v492_v1  ;;  %1362 = vmatpush.msra.mxu3 %v492_v1 }
 0x111   : > { %512 = vmatpush.msra.mxu0 %v491_v2  ;;  %1363 = vmatpush.msra.mxu1 %v491_v2 }
 0x112   : > { %1364 = vmatpush.msra.mxu2 %v491_v2  ;;  %1365 = vmatpush.msra.mxu3 %v491_v2 }
 0x113   : > { %513 = vmatpush.msra.mxu0 %v490_v3  ;;  %1366 = vmatpush.msra.mxu1 %v490_v3 }
 0x114   : > { %1367 = vmatpush.msra.mxu2 %v490_v3  ;;  %1368 = vmatpush.msra.mxu3 %v490_v3 }
 0x115   : > { %514 = vmatpush.msra.mxu0 %v489_v4  ;;  %1369 = vmatpush.msra.mxu1 %v489_v4 }
 0x116   : > { %1370 = vmatpush.msra.mxu2 %v489_v4  ;;  %1371 = vmatpush.msra.mxu3 %v489_v4 }
 0x117   : > { %515 = vmatpush.msra.mxu0 %v488_v5  ;;  %1372 = vmatpush.msra.mxu1 %v488_v5 }
 0x118   : > { %1373 = vmatpush.msra.mxu2 %v488_v5  ;;  %1374 = vmatpush.msra.mxu3 %v488_v5 }
 0x119   : > { %516 = vmatpush.msra.mxu0 %v487_v6  ;;  %1375 = vmatpush.msra.mxu1 %v487_v6 }
 0x11a   : > { %1376 = vmatpush.msra.mxu2 %v487_v6  ;;  %1377 = vmatpush.msra.mxu3 %v487_v6 }
 0x11b   : > { %517 = vmatpush.msra.mxu0 %v486_v7  ;;  %1378 = vmatpush.msra.mxu1 %v486_v7 }
 0x11c   : > { %1379 = vmatpush.msra.mxu2 %v486_v7  ;;  %1380 = vmatpush.msra.mxu3 %v486_v7 }
 0x11d   : > { %518 = vmatmul.f32.vlgmr.msra.gmra.mxu0 %v470_v8  ;;  %530 = vmatmul.f32.vlgmr.msra.gmra.mxu1 %v474_v9 }
 0x11e   : > { %542 = vmatmul.f32.vlgmr.msra.gmra.mxu2 %v478_v10  ;;  %554 = vmatmul.f32.vlgmr.msra.gmra.mxu3 %v482_v11 }
 0x125   : > { %521 = vmatmul.f32.gmra.mxu0 %v471_v12  ;;  %533 = vmatmul.f32.gmra.mxu1 %v475_v13 }
 0x126   : > { %545 = vmatmul.f32.gmra.mxu2 %v479_v14  ;;  %557 = vmatmul.f32.gmra.mxu3 %v483_v15 }
 0x12d   : > { %524 = vmatmul.f32.gmra.mxu0 %v472_v16  ;;  %536 = vmatmul.f32.gmra.mxu1 %v476_v17 }
 0x12e   : > { %548 = vmatmul.f32.gmra.mxu2 %v480_v18  ;;  %560 = vmatmul.f32.gmra.mxu3 %v484_v19 }
 0x135   : > { %527 = vmatmul.f32.gmra.mxu0 %v473_v20  ;;  %539 = vmatmul.f32.gmra.mxu1 %v477_v21 }
 0x136   : > { %551 = vmatmul.f32.gmra.mxu2 %v481_v22  ;;  %563 = vmatmul.f32.gmra.mxu3 %v485_v23 }
 0x19a   : > { %v519_v24 = vpop.f32.mrf.mxu0  ;;  %v531_v25 = vpop.f32.mrf.mxu1 }
 0x1a1   : > { %v543_v26 = vpop.f32.mrf.mxu2  ;;  %v555_v27 = vpop.f32.mrf.mxu3 }
 0x1a2   : > { %v522_v28 = vpop.f32.mrf.mxu0  ;;  %v534_v29 = vpop.f32.mrf.mxu1 }
 0x1a3   : > { %v1234_v30 = vpack.c.bf16 %v522_v28, %v519_v24  ;;  %v1244_v31 = vpack.c.bf16 %v534_v29, %v531_v25 }
 0x1a5   : > { %1235 = vst [vmem:[#allocation3 + $0x30] sm:$0xff] %v1234_v30  }
 0x1a6   : > { %1279 = vst [vmem:[#allocation3 + $0x18] sm:$0xff] %v1244_v31  }
 0x1a9   : > { %v546_v32 = vpop.f32.mrf.mxu2  ;;  %v558_v33 = vpop.f32.mrf.mxu3 }
 0x1aa   : > { %v1254_v34 = vpack.c.bf16 %v546_v32, %v543_v26  ;;  %v1264_v35 = vpack.c.bf16 %v558_v33, %v555_v27  ;;  %v525_v36 = vpop.f32.mrf.mxu0  ;;  %v537_v37 = vpop.f32.mrf.mxu1 }
 0x1ac   : > { %1281 = vst [vmem:[#allocation3 + $0x8] sm:$0xff] %v1254_v34  }
 0x1ad   : > { %1283 = vst [vmem:[#allocation3 + $0x28] sm:$0xff] %v1264_v35  }
 0x1b1   : > { %v549_v38 = vpop.f32.mrf.mxu2  ;;  %v561_v39 = vpop.f32.mrf.mxu3 }
 0x1b2   : > { %v528_v40 = vpop.f32.mrf.mxu0  ;;  %v540_v41 = vpop.f32.mrf.mxu1 }
 0x1b3   : > { %v1239_v42 = vpack.c.bf16 %v528_v40, %v525_v36  ;;  %v1249_v43 = vpack.c.bf16 %v540_v41, %v537_v37 }
 0x1b5   : > { %1278 = vst [vmem:[#allocation3] sm:$0xff] %v1239_v42  }
 0x1b6   : > { %1280 = vst [vmem:[#allocation3 + $0x10] sm:$0xff] %v1249_v43  }
 0x1b9   : > { %v552_v44 = vpop.f32.mrf.mxu2  ;;  %v564_v45 = vpop.f32.mrf.mxu3 }
 0x1ba   : > { %v1259_v46 = vpack.c.bf16 %v552_v44, %v549_v38  ;;  %v1269_v47 = vpack.c.bf16 %v564_v45, %v561_v39 }
 0x1bc   : > { %1282 = vst [vmem:[#allocation3 + $0x20] sm:$0xff] %v1259_v46  }
 0x1bd   : > { %1284 = vst [vmem:[#allocation3 + $0x38] sm:$0xff] %v1269_v47  }
 0x1be PF: > { %v1189_v49 = vld [vmem:[#allocation3 + $0x28] sm:$0xff]  ;;  %v1186_v52 = vld [vmem:[#allocation3 + $0x10] sm:$0xff]  ;;  %v1185_v53 = vld [vmem:[#allocation3 + $0x18] sm:$0xff]  ;;  %p887_p3 = scmp.eq.s32.totalorder %s1697_s18, 2  ;;  %s1712_s18 = smov [#allocation12]  }
 0x1bf   : > { %v1187_v51 = vld [vmem:[#allocation3 + $0x8] sm:$0xff]  ;;  %v1184_v54 = vld [vmem:[#allocation3] sm:$0xff]  ;;  %v1183_v55 = vld [vmem:[#allocation3 + $0x30] sm:$0xff]  ;;  %s965_s6 = sshll.u32 %s1712_s18, 4  ;;  %s967_s14 = sshll.u32 %s2000_s4, 4  ;;  %s966_s6 = int_to_ptr.vmem [resolvable:$true] %s965_s6  ;;  %s968_s14 = int_to_ptr.hbm [resolvable:$true] %s967_s14 }
 0x1c0   : > { %v1175_v56 = vld [vmem:[%s1857_s24] sm:$0xff]  ;;  %v1177_v57 = vld [vmem:[%s1857_s24 + $0x10] sm:$0xff]  ;;  %v1176_v60 = vld [vmem:[%s1857_s24 + $0x8] sm:$0xff]  ;;  %s904_s5 = scalar_select %p887_p3, 1, 0 }
 0x1c1   : > { %v1179_v58 = vld [vmem:[%s1857_s24 + $0x20] sm:$0xff]  ;;  %v1181_v59 = vld [vmem:[%s1857_s24 + $0x30] sm:$0xff]  ;;  %v1178_v61 = vld [vmem:[%s1857_s24 + $0x18] sm:$0xff]  ;;  %p1436_p4 = scmp.eq.s32.totalorder %s1818_s8, 2  ;;  %s1713_s22 = smov 128  }
 0x1c2   : > { %v1180_v62 = vld [vmem:[%s1857_s24 + $0x28] sm:$0xff]  ;;  %v1182_v63 = vld [vmem:[%s1857_s24 + $0x38] sm:$0xff]  ;;  %v1920_v0 = vld [vmem:[%s295_s11] ss:$0 sm:$0xff]  ;;  %v905_v1 = vstv %s904_s5  ;;  %s1714_s27 = smov 8  }
 0x1c3   : > { %v1188_v50 = vld [vmem:[#allocation3 + $0x20] sm:$0xff]  ;;  %vm1924_vm0 = vcmp.eq.s32.totalorder %v905_v1, 1 }
 0x1c4   : > { %v1190_v48 = vld [vmem:[#allocation3 + $0x38] sm:$0xff] }
 0x1c5   : > { %767 = vmatpush.bf16.msra.mxu0 %v1190_v48  ;;  %1381 = vmatpush.bf16.msra.mxu1 %v1190_v48 }
 0x1c6   : > { %1382 = vmatpush.bf16.msra.mxu2 %v1190_v48  ;;  %1383 = vmatpush.bf16.msra.mxu3 %v1190_v48 }
 0x1c9   : > { %768 = vmatpush.bf16.msra.mxu0 %v1189_v49  ;;  %1384 = vmatpush.bf16.msra.mxu1 %v1189_v49 }
 0x1ca   : > { %1385 = vmatpush.bf16.msra.mxu2 %v1189_v49  ;;  %1386 = vmatpush.bf16.msra.mxu3 %v1189_v49 }
 0x1cd   : > { %769 = vmatpush.bf16.msra.mxu0 %v1188_v50  ;;  %1387 = vmatpush.bf16.msra.mxu1 %v1188_v50 }
 0x1ce   : > { %1388 = vmatpush.bf16.msra.mxu2 %v1188_v50  ;;  %1389 = vmatpush.bf16.msra.mxu3 %v1188_v50 }
 0x1d1   : > { %770 = vmatpush.bf16.msra.mxu0 %v1187_v51  ;;  %1390 = vmatpush.bf16.msra.mxu1 %v1187_v51 }
 0x1d2   : > { %1391 = vmatpush.bf16.msra.mxu2 %v1187_v51  ;;  %1392 = vmatpush.bf16.msra.mxu3 %v1187_v51 }
 0x1d5   : > { %771 = vmatpush.bf16.msra.mxu0 %v1186_v52  ;;  %1393 = vmatpush.bf16.msra.mxu1 %v1186_v52 }
 0x1d6   : > { %1394 = vmatpush.bf16.msra.mxu2 %v1186_v52  ;;  %1395 = vmatpush.bf16.msra.mxu3 %v1186_v52 }
 0x1d9   : > { %772 = vmatpush.bf16.msra.mxu0 %v1185_v53  ;;  %1396 = vmatpush.bf16.msra.mxu1 %v1185_v53 }
 0x1da   : > { %1397 = vmatpush.bf16.msra.mxu2 %v1185_v53  ;;  %1398 = vmatpush.bf16.msra.mxu3 %v1185_v53 }
 0x1dd   : > { %773 = vmatpush.bf16.msra.mxu0 %v1184_v54  ;;  %1399 = vmatpush.bf16.msra.mxu1 %v1184_v54 }
 0x1de   : > { %1400 = vmatpush.bf16.msra.mxu2 %v1184_v54  ;;  %1401 = vmatpush.bf16.msra.mxu3 %v1184_v54 }
 0x1e1   : > { %774 = vmatpush.bf16.msra.mxu0 %v1183_v55  ;;  %1402 = vmatpush.bf16.msra.mxu1 %v1183_v55 }
 0x1e2   : > { %1403 = vmatpush.bf16.msra.mxu2 %v1183_v55  ;;  %1404 = vmatpush.bf16.msra.mxu3 %v1183_v55 }
 0x1e4   : > { %775 = vmatmul.bf16.vlgmr.msra.gmra.mxu0 %v1175_v56  ;;  %785 = vmatmul.bf16.vlgmr.msra.gmra.mxu1 %v1177_v57 }
 0x1e5   : > { %795 = vmatmul.bf16.vlgmr.msra.gmra.mxu2 %v1179_v58  ;;  %805 = vmatmul.bf16.vlgmr.msra.gmra.mxu3 %v1181_v59 }
 0x1f4   : > { %780 = vmatmul.bf16.gmra.mxu0 %v1176_v60  ;;  %790 = vmatmul.bf16.gmra.mxu1 %v1178_v61 }
 0x1f5   : > { %800 = vmatmul.bf16.gmra.mxu2 %v1180_v62  ;;  %810 = vmatmul.bf16.gmra.mxu3 %v1182_v63 }
 0x261   : > { %v776_v2 = vpop.f32.mrf.mxu0  ;;  %v786_v3 = vpop.f32.mrf.mxu1 }
 0x262   : > { %v871_v4 = vadd.f32 %v1920_v0, %v776_v2  ;;  %v875_v5 = vadd.f32 %v1920_v0, %v786_v3 }
 0x264   : > { %v888_v7 = vmax.f32 %v871_v4, 0.0  ;;  %v892_v8 = vmax.f32 %v875_v5, 0.0 }
 0x266   : > { %v907_v9 = vsel %vm1924_vm0, %v871_v4, %v888_v7  ;;  %v911_v10 = vsel %vm1924_vm0, %v875_v5, %v892_v8 }
 0x267   : > { %925 = vst [vmem:[#allocation4] sm:$0xff] %v907_v9 }
 0x268   : > { %941 = vst [vmem:[#allocation12] sm:$0xff] %v907_v9  ;;  %v796_v11 = vpop.f32.mrf.mxu2  ;;  %v806_v12 = vpop.f32.mrf.mxu3 }
 0x269   : > { %929 = vst [vmem:[#allocation4 + $0x68] sm:$0xff] %v911_v10  ;;  %v879_v13 = vadd.f32 %v1920_v0, %v796_v11  ;;  %v883_v14 = vadd.f32 %v1920_v0, %v806_v12  ;;  %v778_v15 = vpop.f32.mrf.mxu0  ;;  %v788_v16 = vpop.f32.mrf.mxu1 }
 0x26a   : > { %945 = vst [vmem:[#allocation12 + $0x20] sm:$0xff] %v911_v10  ;;  %v872_v17 = vadd.f32 %v1920_v0, %v778_v15  ;;  %v876_v18 = vadd.f32 %v1920_v0, %v788_v16 }
 0x26b   : > { %v896_v19 = vmax.f32 %v879_v13, 0.0  ;;  %v900_v20 = vmax.f32 %v883_v14, 0.0 }
 0x26c   : > { %v889_v21 = vmax.f32 %v872_v17, 0.0  ;;  %v893_v24 = vmax.f32 %v876_v18, 0.0 }
 0x26d   : > { %v915_v22 = vsel %vm1924_vm0, %v879_v13, %v896_v19  ;;  %v919_v23 = vsel %vm1924_vm0, %v883_v14, %v900_v20 }
 0x26e   : > { %933 = vst [vmem:[#allocation4 + $0x28] sm:$0xff] %v915_v22  ;;  %v908_v25 = vsel %vm1924_vm0, %v872_v17, %v889_v21  ;;  %v912_v28 = vsel %vm1924_vm0, %v876_v18, %v893_v24 }
 0x26f   : > { %949 = vst [vmem:[#allocation12 + $0x40] sm:$0xff] %v915_v22 }
 0x270   : > { %937 = vst [vmem:[#allocation4 + $0x58] sm:$0xff] %v919_v23  ;;  %v798_v26 = vpop.f32.mrf.mxu2  ;;  %v808_v27 = vpop.f32.mrf.mxu3 }
 0x271   : > { %953 = vst [vmem:[#allocation12 + $0x60] sm:$0xff] %v919_v23  ;;  %v880_v29 = vadd.f32 %v1920_v0, %v798_v26  ;;  %v884_v30 = vadd.f32 %v1920_v0, %v808_v27  ;;  %v781_v31 = vpop.f32.mrf.mxu0  ;;  %v791_v32 = vpop.f32.mrf.mxu1 }
 0x272   : > { %926 = vst [vmem:[#allocation4 + $0x18] sm:$0xff] %v908_v25  ;;  %v873_v33 = vadd.f32 %v1920_v0, %v781_v31  ;;  %v877_v34 = vadd.f32 %v1920_v0, %v791_v32 }
 0x273   : > { %942 = vst [vmem:[#allocation12 + $0x8] sm:$0xff] %v908_v25  ;;  %v897_v35 = vmax.f32 %v880_v29, 0.0  ;;  %v901_v36 = vmax.f32 %v884_v30, 0.0 }
 0x274   : > { %930 = vst [vmem:[#allocation4 + $0x20] sm:$0xff] %v912_v28  ;;  %v890_v37 = vmax.f32 %v873_v33, 0.0  ;;  %v894_v40 = vmax.f32 %v877_v34, 0.0 }
 0x275   : > { %946 = vst [vmem:[#allocation12 + $0x28] sm:$0xff] %v912_v28  ;;  %v916_v38 = vsel %vm1924_vm0, %v880_v29, %v897_v35  ;;  %v920_v39 = vsel %vm1924_vm0, %v884_v30, %v901_v36 }
 0x276   : > { %934 = vst [vmem:[#allocation4 + $0x40] sm:$0xff] %v916_v38  ;;  %v909_v41 = vsel %vm1924_vm0, %v873_v33, %v890_v37  ;;  %v913_v44 = vsel %vm1924_vm0, %v877_v34, %v894_v40 }
 0x277   : > { %950 = vst [vmem:[#allocation12 + $0x48] sm:$0xff] %v916_v38 }
 0x278   : > { %938 = vst [vmem:[#allocation4 + $0x48] sm:$0xff] %v920_v39  ;;  %v801_v42 = vpop.f32.mrf.mxu2  ;;  %v811_v43 = vpop.f32.mrf.mxu3 }
 0x279   : > { %954 = vst [vmem:[#allocation12 + $0x68] sm:$0xff] %v920_v39  ;;  %v881_v45 = vadd.f32 %v1920_v0, %v801_v42  ;;  %v885_v46 = vadd.f32 %v1920_v0, %v811_v43  ;;  %v783_v47 = vpop.f32.mrf.mxu0  ;;  %v793_v48 = vpop.f32.mrf.mxu1 }
 0x27a   : > { %927 = vst [vmem:[#allocation4 + $0x50] sm:$0xff] %v909_v41  ;;  %v874_v49 = vadd.f32 %v1920_v0, %v783_v47  ;;  %v878_v50 = vadd.f32 %v1920_v0, %v793_v48 }
 0x27b   : > { %943 = vst [vmem:[#allocation12 + $0x10] sm:$0xff] %v909_v41  ;;  %v898_v51 = vmax.f32 %v881_v45, 0.0  ;;  %v902_v52 = vmax.f32 %v885_v46, 0.0 }
 0x27c   : > { %931 = vst [vmem:[#allocation4 + $0x70] sm:$0xff] %v913_v44  ;;  %v891_v53 = vmax.f32 %v874_v49, 0.0  ;;  %v895_v56 = vmax.f32 %v878_v50, 0.0 }
 0x27d   : > { %947 = vst [vmem:[#allocation12 + $0x30] sm:$0xff] %v913_v44  ;;  %v917_v54 = vsel %vm1924_vm0, %v881_v45, %v898_v51  ;;  %v921_v55 = vsel %vm1924_vm0, %v885_v46, %v902_v52 }
 0x27e   : > { %935 = vst [vmem:[#allocation4 + $0x38] sm:$0xff] %v917_v54  ;;  %v910_v57 = vsel %vm1924_vm0, %v874_v49, %v891_v53  ;;  %v914_v60 = vsel %vm1924_vm0, %v878_v50, %v895_v56 }
 0x27f   : > { %951 = vst [vmem:[#allocation12 + $0x50] sm:$0xff] %v917_v54 }
 0x280   : > { %939 = vst [vmem:[#allocation4 + $0x78] sm:$0xff] %v921_v55  ;;  %v803_v58 = vpop.f32.mrf.mxu2  ;;  %v813_v59 = vpop.f32.mrf.mxu3 }
 0x281   : > { %955 = vst [vmem:[#allocation12 + $0x70] sm:$0xff] %v921_v55  ;;  %v882_v61 = vadd.f32 %v1920_v0, %v803_v58  ;;  %v886_v62 = vadd.f32 %v1920_v0, %v813_v59 }
 0x282   : > { %928 = vst [vmem:[#allocation4 + $0x60] sm:$0xff] %v910_v57 }
 0x283   : > { %944 = vst [vmem:[#allocation12 + $0x18] sm:$0xff] %v910_v57  ;;  %v899_v63 = vmax.f32 %v882_v61, 0.0  ;;  %v903_v1 = vmax.f32 %v886_v62, 0.0 }
 0x284   : > { %932 = vst [vmem:[#allocation4 + $0x10] sm:$0xff] %v914_v60 }
 0x285   : > { %948 = vst [vmem:[#allocation12 + $0x38] sm:$0xff] %v914_v60  ;;  %v918_v2 = vsel %vm1924_vm0, %v882_v61, %v899_v63  ;;  %v922_v3 = vsel %vm1924_vm0, %v886_v62, %v903_v1 }
 0x286   : > { %936 = vst [vmem:[#allocation4 + $0x8] sm:$0xff] %v918_v2 }
 0x287   : > { %952 = vst [vmem:[#allocation12 + $0x58] sm:$0xff] %v918_v2 }
 0x288   : > { %940 = vst [vmem:[#allocation4 + $0x30] sm:$0xff] %v922_v3 }
 0x289   : > { %956 = vst [vmem:[#allocation12 + $0x78] sm:$0xff] %v922_v3 }
 0x28a   : > { %1416 = dma.vmem_to_hbm [thread:$0]  (%p1436_p4), %s966_s6, 2048, %s968_s14, [#allocation7], %s1713_s22, %s1713_s22, %s1714_s27  }
 0x28b   : > { %1680 = dma.done.wait (%p1436_p4), [#allocation7], 2048  }
 0x28c   : > { %1682 = vsyncadd (%p1436_p4), [#allocation7], 4294965248 }
 0x28d PF: > { %s19_s20 = sadd.s32 1, %s1705_s20   ;;  %s2007_s15 = smov %s1689_s16 }
 0x28e   : > { %p16_p5 = scmp.ge.s32.totalorder %s19_s20, 5   ;;  %s2008_s16 = smov %s1693_s17 }
 0x28f   : > { %s2009_s17 = smov %s1790_s28  ;;  %s2010_s18 = smov %s1701_s19 }
 0x290   : > { %s2011_s19 = smov %s2013_s21  ;;  %18 = sbr.rel (!%p16_p5) target bundleno = 6 (0x6), region = 122 }
 0x295   :  { %984 = vsyncpa [#allocation6], 1 }
 0x296   :  { %986 = vsyncpa [#allocation6 + $0x1], 1 }
 0x297   :  { %987 = vsyncpa [#allocation9], 1 }
 0x298   :  { %988 = vsyncpa [#allocation7], 1 }
 0x299   :  { %990 = vsyncpa [#allocation7 + $0x1], 1 }

</bundles_post_ra>
